<compile_context>
chip_gen: v6e
topology: v6e:2x2x1
jax: 0.10.0
libtpu: 0.0.40
codegen_flags: <defaults>
</compile_context>

<pallas_src>
import functools

import jax
import jax.numpy as jnp
from jax import lax
from jax.experimental import pallas as pl
from jax.experimental.pallas import tpu as pltpu

LANE = 128
SUBLANE = 8


def _round_up(v, m):
    return ((v + m - 1) // m) * m


def _label_sums_kernel(x_ref, lbl_ref, sxt_ref, sx_ref, st_ref, *,
                       rows_tile, tiles_per_split, hw, num_classes, mask_tail):
    """Per-class sum(x*t), sum(x), sum(t) with the one-hot mask built in-kernel."""
    j = pl.program_id(2)

    @pl.when(j == 0)
    def _():
        sxt_ref[...] = jnp.zeros_like(sxt_ref)
        sx_ref[...] = jnp.zeros_like(sx_ref)
        st_ref[...] = jnp.zeros_like(st_ref)

    x = x_ref[0].astype(jnp.float32)          # (C, R, 128)
    lbl = lbl_ref[0]                          # (R, 128) int32

    if mask_tail:
        # Element-granular validity: covers the 128-lane pad of H*W, the
        # partial last row tile and fully-phantom tiles from the uneven split.
        tile_idx = pl.program_id(0) * tiles_per_split + j
        row = lax.broadcasted_iota(jnp.int32, (rows_tile, LANE), 0)
        col = lax.broadcasted_iota(jnp.int32, (rows_tile, LANE), 1)
        elem = (tile_idx * rows_tile + row) * LANE + col
        valid = elem < hw
        x = jnp.where(valid[None, :, :], x, 0.0)
        lbl = jnp.where(valid, lbl, -1)       # -1 matches no class

    # One-hot mask from integer labels (out-of-range labels match no class,
    # same semantics as jax.nn.one_hot).
    cls = lax.broadcasted_iota(jnp.int32, (num_classes, rows_tile, LANE), 0)
    t = lbl[None, :, :] == cls                # (C, R, 128) bool

    # Sublane/row-axis reduces only: accumulators stay lane-wide (C, 128); the
    # single cross-lane reduce happens in the JAX epilogue.
    sxt_ref[0, 0] += jnp.sum(jnp.where(t, x, 0.0), axis=1)
    sx_ref[0, 0] += jnp.sum(x, axis=1)
    st_ref[0, 0] += jnp.sum(t.astype(jnp.float32), axis=1)


def _dense_sums_kernel(x_ref, t_ref, sxt_ref, sx_ref, st_ref, *,
                       rows_tile, tiles_per_split, hw, mask_tail):
    """Per-class sum(x*t), sum(x), sum(t) for an already one-hot (dense) target."""
    j = pl.program_id(2)

    @pl.when(j == 0)
    def _():
        sxt_ref[...] = jnp.zeros_like(sxt_ref)
        sx_ref[...] = jnp.zeros_like(sx_ref)
        st_ref[...] = jnp.zeros_like(st_ref)

    x = x_ref[0].astype(jnp.float32)          # (C, R, 128)
    t = t_ref[0].astype(jnp.float32)          # (C, R, 128)

    if mask_tail:
        tile_idx = pl.program_id(0) * tiles_per_split + j
        row = lax.broadcasted_iota(jnp.int32, (rows_tile, LANE), 0)
        col = lax.broadcasted_iota(jnp.int32, (rows_tile, LANE), 1)
        elem = (tile_idx * rows_tile + row) * LANE + col
        valid = (elem < hw)[None, :, :]
        x = jnp.where(valid, x, 0.0)
        t = jnp.where(valid, t, 0.0)

    sxt_ref[0, 0] += jnp.sum(x * t, axis=1)
    sx_ref[0, 0] += jnp.sum(x, axis=1)
    st_ref[0, 0] += jnp.sum(t, axis=1)


def mc_focal_tversky_loss(inputs, target, class_weights=None,
                          alpha_t=0.7, beta_t=0.3, gamma_f=4.0 / 3.0,
                          smooth=1e-6, tile_bytes=8 * 1024 * 1024):
    """inputs: (B, C, H, W) predictions; target: (B, C, H, W) one-hot or (B, H, W) int labels."""
    B, C, H, W = inputs.shape
    if class_weights is None:
        class_weights = [1.0] * C
    if len(class_weights) != C:
        raise ValueError("Please provide matching weights")

    # TODO(synk): the reference prints a host-side warning on non-finite
    # inputs/targets; that has no in-kernel equivalent and is omitted.

    label_path = target.ndim != inputs.ndim
    hw = H * W
    itemsize = inputs.dtype.itemsize
    t_itemsize = 4 if label_path else jnp.dtype(target.dtype).itemsize

    # --- Row tiling over the flattened spatial axis ---------------------------
    rows_total = pl.cdiv(hw, LANE)            # 128-lane rows of real data
    r_cap = max(SUBLANE, (tile_bytes // (C * LANE * itemsize)) // SUBLANE * SUBLANE)
    rows_tile = min(r_cap, _round_up(rows_total, SUBLANE))

    # Keep actual VMEM usage (double-buffered blocks + f32 intermediates +
    # headroom) inside physical VMEM on every chip generation.
    try:
        vmem_physical = int(pltpu.get_tpu_info().vmem_capacity_bytes)
    except Exception:
        vmem_physical = 64 * 1024 * 1024      # v7x per-TC VMEM (smallest)
    vmem_cap = int(0.9 * vmem_physical)

    def _need_bytes(rt):
        xb = C * rt * LANE * itemsize
        tb = (rt * LANE * 4) if label_path else (C * rt * LANE * t_itemsize)
        xb32 = C * rt * LANE * 4              # in-kernel f32 intermediates scale
        return 2 * (xb + tb) + 3 * xb32 + (4 << 20)

    while rows_tile > SUBLANE and _need_bytes(rows_tile) > vmem_cap:
        rows_tile = max(SUBLANE, (rows_tile // 2) // SUBLANE * SUBLANE)

    rows_arr = max(rows_total, rows_tile)     # rows extent of the 4D view (>= block)
    hw_arr = rows_arr * LANE

    # --- Lane-dense 4D views (free reshapes; pad only when H*W % 128 != 0 or
    # the input is smaller than one tile — padded elements are masked in-kernel).
    x = inputs.reshape(B, C, hw)
    if hw_arr != hw:
        x = jnp.pad(x, ((0, 0), (0, 0), (0, hw_arr - hw)))
    x = x.reshape(B, C, rows_arr, LANE)

    if label_path:
        # TODO(synk): the PyTorch reference applies an extra (buggy) permute for
        # index-valued targets; we implement the intended one-hot semantics.
        lbl = target.reshape(B, hw).astype(jnp.int32)
        if hw_arr != hw:
            lbl = jnp.pad(lbl, ((0, 0), (0, hw_arr - hw)), constant_values=-1)
        t_arr = lbl.reshape(B, rows_arr, LANE)
    else:
        t = target.reshape(B, C, hw)
        if hw_arr != hw:
            t = jnp.pad(t, ((0, 0), (0, 0), (0, hw_arr - hw)))
        t_arr = t.reshape(B, C, rows_arr, LANE)

    # --- Grid: (split, batch, row tiles) --------------------------------------
    n_row_tiles = pl.cdiv(rows_arr, rows_tile)
    # A 2-way split of the row reduction keeps both v7x TensorCores busy when
    # the batch axis alone cannot (B == 1 or odd); on single-TC chips it costs
    # at most one duplicated (fully masked) tile per image.
    nsplit = 2 if (B % 2 == 1 and n_row_tiles >= 2) else 1
    tiles_per_split = pl.cdiv(n_row_tiles, nsplit)
    mask_tail = (nsplit * tiles_per_split * rows_tile * LANE) != hw
    need_clamp = (nsplit * tiles_per_split) != n_row_tiles

    def row_block(s, j):
        idx = s * tiles_per_split + j
        if need_clamp:
            # Phantom tiles from the uneven split re-read the last valid block;
            # their contribution is zeroed by the in-kernel element mask.
            idx = jnp.minimum(idx, n_row_tiles - 1)
        return idx

    x_spec = pl.BlockSpec((1, C, rows_tile, LANE),
                          lambda s, b, j: (b, 0, row_block(s, j), 0))
    if label_path:
        t_spec = pl.BlockSpec((1, rows_tile, LANE),
                              lambda s, b, j: (b, row_block(s, j), 0))
        kernel = functools.partial(_label_sums_kernel, rows_tile=rows_tile,
                                   tiles_per_split=tiles_per_split, hw=hw,
                                   num_classes=C, mask_tail=mask_tail)
    else:
        t_spec = pl.BlockSpec((1, C, rows_tile, LANE),
                              lambda s, b, j: (b, 0, row_block(s, j), 0))
        kernel = functools.partial(_dense_sums_kernel, rows_tile=rows_tile,
                                   tiles_per_split=tiles_per_split, hw=hw,
                                   mask_tail=mask_tail)

    acc_shape = jax.ShapeDtypeStruct((nsplit, B, C, LANE), jnp.float32)
    acc_spec = pl.BlockSpec((1, 1, C, LANE), lambda s, b, j: (s, b, 0, 0))

    vmem_limit = int(min(max(_need_bytes(rows_tile), 16 << 20), vmem_physical))

    p_xt, p_x, p_t = pl.pallas_call(
        kernel,
        out_shape=(acc_shape, acc_shape, acc_shape),
        grid_spec=pltpu.PrefetchScalarGridSpec(
            num_scalar_prefetch=0,
            grid=(nsplit, B, tiles_per_split),
            in_specs=[x_spec, t_spec],
            out_specs=[acc_spec, acc_spec, acc_spec],
        ),
        compiler_params=pltpu.CompilerParams(
            dimension_semantics=("parallel", "parallel", "arbitrary"),
            vmem_limit_bytes=vmem_limit),
    )(x, t_arr)

    # Tiny epilogue in plain JAX on the (split, B, C, 128) partials.
    tp = jnp.sum(p_xt, axis=(0, 1, 3))                    # sum(x * t) per class
    fp = jnp.sum(p_x, axis=(0, 1, 3)) - tp                # sum((1 - t) * x)
    fn = jnp.sum(p_t, axis=(0, 1, 3)) - tp                # sum(t * (1 - x))
    tversky = (tp + smooth) / (tp + alpha_t * fn + beta_t * fp + smooth)
    # Clamp: fp32 rounding could push (1 - tversky) microscopically negative,
    # which would make the non-integer power return NaN.
    focal = jnp.maximum(1.0 - tversky, 0.0) ** gamma_f
    w = jnp.asarray(class_weights, dtype=jnp.float32)
    return jnp.sum(w * focal)


def _reference_loss(inputs, target, class_weights,
                    alpha_t=0.7, beta_t=0.3, gamma_f=4.0 / 3.0, smooth=1e-6):
    C = inputs.shape[1]
    x = jnp.transpose(inputs, (1, 0, 2, 3)).reshape(C, -1).astype(jnp.float32)
    t = jnp.transpose(target, (1, 0, 2, 3)).reshape(C, -1).astype(jnp.float32)
    tp = jnp.sum(x * t, axis=1)
    fp = jnp.sum((1.0 - t) * x, axis=1)
    fn = jnp.sum(t * (1.0 - x), axis=1)
    tversky = (tp + smooth) / (tp + alpha_t * fn + beta_t * fp + smooth)
    focal = (1.0 - tversky) ** gamma_f
    return jnp.sum(jnp.asarray(class_weights, jnp.float32) * focal)


if __name__ == "__main__":
    key = jax.random.PRNGKey(0)
    B, C, H, W = 2, 4, 16, 16
    k1, k2, k3, k4 = jax.random.split(key, 4)

    logits = jax.random.normal(k1, (B, C, H, W), dtype=jnp.float32)
    preds = jax.nn.softmax(logits, axis=1)                 # predictions in [0, 1]
    labels = jax.random.randint(k2, (B, H, W), 0, C)
    target_onehot = jax.nn.one_hot(labels, C, axis=1, dtype=jnp.float32)
    class_weights = [1.0, 2.0, 0.5, 1.5]

    ref = _reference_loss(preds, target_onehot, class_weights)

    # One-hot (dense) target path.
    loss_dense = jax.block_until_ready(
        mc_focal_tversky_loss(preds, target_onehot, class_weights))
    assert jnp.allclose(loss_dense, ref, rtol=1e-5, atol=1e-6), (loss_dense, ref)

    # Integer-label target path (one-hot mask built in-kernel, no HBM one-hot).
    loss_lbl = jax.block_until_ready(
        mc_focal_tversky_loss(preds, labels, class_weights))
    assert jnp.allclose(loss_lbl, ref, rtol=1e-5, atol=1e-6), (loss_lbl, ref)

    # bf16 predictions streamed natively, accumulated in f32 in-kernel.
    preds_bf16 = preds.astype(jnp.bfloat16)
    ref_bf16 = _reference_loss(preds_bf16.astype(jnp.float32), target_onehot,
                               class_weights)
    loss_bf16 = jax.block_until_ready(
        mc_focal_tversky_loss(preds_bf16, labels, class_weights))
    assert jnp.allclose(loss_bf16, ref_bf16, rtol=1e-4, atol=1e-5), (loss_bf16, ref_bf16)

    # Odd batch + small tiles: exercises the 2-way row split, the uneven-split
    # phantom-tile clamp, the H*W % 128 pad and the in-kernel element mask.
    H2, W2 = 60, 60
    logits2 = jax.random.normal(k3, (1, C, H2, W2), dtype=jnp.float32)
    preds2 = jax.nn.softmax(logits2, axis=1)
    labels2 = jax.random.randint(k4, (1, H2, W2), 0, C)
    onehot2 = jax.nn.one_hot(labels2, C, axis=1, dtype=jnp.float32)
    ref2 = _reference_loss(preds2, onehot2, class_weights)
    loss2 = jax.block_until_ready(
        mc_focal_tversky_loss(preds2, labels2, class_weights, tile_bytes=8192))
    assert jnp.allclose(loss2, ref2, rtol=1e-5, atol=1e-6), (loss2, ref2)

    print("KERNEL_OK")
</pallas_src>

<mosaic_0001>
module attributes {stable_mosaic.version = 11 : i64} {
  func.func @_dense_sums_kernel(%arg0: i32, %arg1: i32, %arg2: i32, %arg3: memref<1x4x8x128xf32, #tpu.memory_space<vmem>>, %arg4: memref<1x4x8x128xf32, #tpu.memory_space<vmem>>, %arg5: memref<1x1x4x128xf32, #tpu.memory_space<vmem>>, %arg6: memref<1x1x4x128xf32, #tpu.memory_space<vmem>>, %arg7: memref<1x1x4x128xf32, #tpu.memory_space<vmem>>) attributes {dimension_semantics = [#tpu.dimension_semantics<parallel>, #tpu.dimension_semantics<parallel>, #tpu.dimension_semantics<arbitrary>], iteration_bounds = array<i64: 1, 2, 1>, scalar_prefetch = 0 : i64, scratch_operands = 0 : i64, tpu.core_type = #tpu.core_type<tc>, window_params = [{transform_indices = @transform_0, window_bounds = array<i64: 1, 4, 8, 128>}, {transform_indices = @transform_1, window_bounds = array<i64: 1, 4, 8, 128>}, {transform_indices = @transform_2, window_bounds = array<i64: 1, 1, 4, 128>}, {transform_indices = @transform_3, window_bounds = array<i64: 1, 1, 4, 128>}, {transform_indices = @transform_4, window_bounds = array<i64: 1, 1, 4, 128>}]} {
    %c0_i32 = arith.constant 0 : i32
    %0 = arith.cmpi eq, %arg2, %c0_i32 : i32
    %1 = arith.extui %0 : i1 to i32
    %c0_i32_0 = arith.constant 0 : i32
    %2 = arith.cmpi ne, %1, %c0_i32_0 : i32
    scf.if %2 {
      %cst_36 = arith.constant 0.000000e+00 : f32
      %50 = vector.broadcast %cst_36 : f32 to vector<1x1x4x128xf32>
      %c0_37 = arith.constant 0 : index
      %c0_38 = arith.constant 0 : index
      %c0_39 = arith.constant 0 : index
      %c0_40 = arith.constant 0 : index
      %51 = vector.load %arg5[%c0_37, %c0_38, %c0_39, %c0_40] : memref<1x1x4x128xf32, #tpu.memory_space<vmem>>, vector<1x1x4x128xf32>
      tpu.vector_store %arg5[%c0_37, %c0_38, %c0_39, %c0_40], %50 {strides = array<i32>} : memref<1x1x4x128xf32, #tpu.memory_space<vmem>>, vector<1x1x4x128xf32>,
      %cst_41 = arith.constant 0.000000e+00 : f32
      %52 = vector.broadcast %cst_41 : f32 to vector<1x1x4x128xf32>
      %c0_42 = arith.constant 0 : index
      %c0_43 = arith.constant 0 : index
      %c0_44 = arith.constant 0 : index
      %c0_45 = arith.constant 0 : index
      %53 = vector.load %arg6[%c0_42, %c0_43, %c0_44, %c0_45] : memref<1x1x4x128xf32, #tpu.memory_space<vmem>>, vector<1x1x4x128xf32>
      tpu.vector_store %arg6[%c0_42, %c0_43, %c0_44, %c0_45], %52 {strides = array<i32>} : memref<1x1x4x128xf32, #tpu.memory_space<vmem>>, vector<1x1x4x128xf32>,
      %cst_46 = arith.constant 0.000000e+00 : f32
      %54 = vector.broadcast %cst_46 : f32 to vector<1x1x4x128xf32>
      %c0_47 = arith.constant 0 : index
      %c0_48 = arith.constant 0 : index
      %c0_49 = arith.constant 0 : index
      %c0_50 = arith.constant 0 : index
      %55 = vector.load %arg7[%c0_47, %c0_48, %c0_49, %c0_50] : memref<1x1x4x128xf32, #tpu.memory_space<vmem>>, vector<1x1x4x128xf32>
      tpu.vector_store %arg7[%c0_47, %c0_48, %c0_49, %c0_50], %54 {strides = array<i32>} : memref<1x1x4x128xf32, #tpu.memory_space<vmem>>, vector<1x1x4x128xf32>,
    } else {
    }
    %c0 = arith.constant 0 : index
    %c0_1 = arith.constant 0 : index
    %c0_2 = arith.constant 0 : index
    %c0_3 = arith.constant 0 : index
    %3 = vector.load %arg3[%c0, %c0_1, %c0_2, %c0_3] : memref<1x4x8x128xf32, #tpu.memory_space<vmem>>, vector<1x4x8x128xf32>
    %4 = vector.shape_cast %3 : vector<1x4x8x128xf32> to vector<4x8x128xf32>
    %c0_4 = arith.constant 0 : index
    %c0_5 = arith.constant 0 : index
    %c0_6 = arith.constant 0 : index
    %c0_7 = arith.constant 0 : index
    %5 = vector.load %arg4[%c0_4, %c0_5, %c0_6, %c0_7] : memref<1x4x8x128xf32, #tpu.memory_space<vmem>>, vector<1x4x8x128xf32>
    %6 = vector.shape_cast %5 : vector<1x4x8x128xf32> to vector<4x8x128xf32>
    %c1_i32 = arith.constant 1 : i32
    %7 = arith.muli %arg0, %c1_i32 : i32
    %8 = arith.addi %7, %arg2 : i32
    %9 = tpu.iota {dimensions = array<i32: 0>} : vector<8x128xi32>
    %10 = tpu.iota {dimensions = array<i32: 1>} : vector<8x128xi32>
    %c8_i32 = arith.constant 8 : i32
    %11 = arith.muli %8, %c8_i32 : i32
    %12 = vector.broadcast %11 : i32 to vector<8x128xi32>
    %13 = arith.addi %12, %9 : vector<8x128xi32>
    %c128_i32 = arith.constant 128 : i32
    %14 = vector.broadcast %c128_i32 : i32 to vector<8x128xi32>
    %15 = arith.muli %13, %14 : vector<8x128xi32>
    %16 = arith.addi %15, %10 : vector<8x128xi32>
    %c256_i32 = arith.constant 256 : i32
    %17 = vector.broadcast %c256_i32 : i32 to vector<8x128xi32>
    %18 = arith.cmpi slt, %16, %17 : vector<8x128xi32>
    %19 = vector.shape_cast %18 : vector<8x128xi1> to vector<1x8x128xi1>
    %cst = arith.constant 0.000000e+00 : f32
    %20 = vector.shape_cast %19 : vector<1x8x128xi1> to vector<1x8x128xi1>
    %21 = vector.broadcast %20 : vector<1x8x128xi1> to vector<4x8x128xi1>
    %22 = vector.broadcast %cst : f32 to vector<4x8x128xf32>
    %23 = arith.select %21, %4, %22 : vector<4x8x128xi1>, vector<4x8x128xf32>
    %cst_8 = arith.constant 0.000000e+00 : f32
    %24 = vector.shape_cast %19 : vector<1x8x128xi1> to vector<1x8x128xi1>
    %25 = vector.broadcast %24 : vector<1x8x128xi1> to vector<4x8x128xi1>
    %26 = vector.broadcast %cst_8 : f32 to vector<4x8x128xf32>
    %27 = arith.select %25, %6, %26 : vector<4x8x128xi1>, vector<4x8x128xf32>
    %c0_9 = arith.constant 0 : index
    %c0_10 = arith.constant 0 : index
    %c0_11 = arith.constant 0 : index
    %c0_12 = arith.constant 0 : index
    %28 = vector.load %arg5[%c0_9, %c0_10, %c0_11, %c0_12] : memref<1x1x4x128xf32, #tpu.memory_space<vmem>>, vector<1x1x4x128xf32>
    %29 = vector.shape_cast %28 : vector<1x1x4x128xf32> to vector<4x128xf32>
    %30 = arith.mulf %23, %27 : vector<4x8x128xf32>
    %cst_13 = arith.constant dense<0.000000e+00> : vector<4x128xf32>
    %31 = vector.multi_reduction <add>, %30, %cst_13 [1] : vector<4x8x128xf32> to vector<4x128xf32>
    %32 = arith.addf %29, %31 : vector<4x128xf32>
    %c0_14 = arith.constant 0 : index
    %c0_15 = arith.constant 0 : index
    %c0_16 = arith.constant 0 : index
    %c0_17 = arith.constant 0 : index
    %33 = vector.load %arg5[%c0_14, %c0_15, %c0_16, %c0_17] : memref<1x1x4x128xf32, #tpu.memory_space<vmem>>, vector<1x1x4x128xf32>
    %34 = vector.shape_cast %33 : vector<1x1x4x128xf32> to vector<4x128xf32>
    %35 = vector.shape_cast %32 : vector<4x128xf32> to vector<1x1x4x128xf32>
    tpu.vector_store %arg5[%c0_14, %c0_15, %c0_16, %c0_17], %35 {strides = array<i32>} : memref<1x1x4x128xf32, #tpu.memory_space<vmem>>, vector<1x1x4x128xf32>,
    %c0_18 = arith.constant 0 : index
    %c0_19 = arith.constant 0 : index
    %c0_20 = arith.constant 0 : index
    %c0_21 = arith.constant 0 : index
    %36 = vector.load %arg6[%c0_18, %c0_19, %c0_20, %c0_21] : memref<1x1x4x128xf32, #tpu.memory_space<vmem>>, vector<1x1x4x128xf32>
    %37 = vector.shape_cast %36 : vector<1x1x4x128xf32> to vector<4x128xf32>
    %cst_22 = arith.constant dense<0.000000e+00> : vector<4x128xf32>
    %38 = vector.multi_reduction <add>, %23, %cst_22 [1] : vector<4x8x128xf32> to vector<4x128xf32>
    %39 = arith.addf %37, %38 : vector<4x128xf32>
    %c0_23 = arith.constant 0 : index
    %c0_24 = arith.constant 0 : index
    %c0_25 = arith.constant 0 : index
    %c0_26 = arith.constant 0 : index
    %40 = vector.load %arg6[%c0_23, %c0_24, %c0_25, %c0_26] : memref<1x1x4x128xf32, #tpu.memory_space<vmem>>, vector<1x1x4x128xf32>
    %41 = vector.shape_cast %40 : vector<1x1x4x128xf32> to vector<4x128xf32>
    %42 = vector.shape_cast %39 : vector<4x128xf32> to vector<1x1x4x128xf32>
    tpu.vector_store %arg6[%c0_23, %c0_24, %c0_25, %c0_26], %42 {strides = array<i32>} : memref<1x1x4x128xf32, #tpu.memory_space<vmem>>, vector<1x1x4x128xf32>,
    %c0_27 = arith.constant 0 : index
    %c0_28 = arith.constant 0 : index
    %c0_29 = arith.constant 0 : index
    %c0_30 = arith.constant 0 : index
    %43 = vector.load %arg7[%c0_27, %c0_28, %c0_29, %c0_30] : memref<1x1x4x128xf32, #tpu.memory_space<vmem>>, vector<1x1x4x128xf32>
    %44 = vector.shape_cast %43 : vector<1x1x4x128xf32> to vector<4x128xf32>
    %cst_31 = arith.constant dense<0.000000e+00> : vector<4x128xf32>
    %45 = vector.multi_reduction <add>, %27, %cst_31 [1] : vector<4x8x128xf32> to vector<4x128xf32>
    %46 = arith.addf %44, %45 : vector<4x128xf32>
    %c0_32 = arith.constant 0 : index
    %c0_33 = arith.constant 0 : index
    %c0_34 = arith.constant 0 : index
    %c0_35 = arith.constant 0 : index
    %47 = vector.load %arg7[%c0_32, %c0_33, %c0_34, %c0_35] : memref<1x1x4x128xf32, #tpu.memory_space<vmem>>, vector<1x1x4x128xf32>
    %48 = vector.shape_cast %47 : vector<1x1x4x128xf32> to vector<4x128xf32>
    %49 = vector.shape_cast %46 : vector<4x128xf32> to vector<1x1x4x128xf32>
    tpu.vector_store %arg7[%c0_32, %c0_33, %c0_34, %c0_35], %49 {strides = array<i32>} : memref<1x1x4x128xf32, #tpu.memory_space<vmem>>, vector<1x1x4x128xf32>,
    return
  }
  func.func @transform_0(%arg0: i32, %arg1: i32, %arg2: i32) -> (i32, i32, i32, i32) {
    %c1_i32 = arith.constant 1 : i32
    %0 = arith.muli %arg0, %c1_i32 : i32
    %1 = arith.addi %0, %arg2 : i32
    %c0_i32 = arith.constant 0 : i32
    %c0_i32_0 = arith.constant 0 : i32
    %c0_i32_1 = arith.constant 0 : i32
    return %arg1, %c0_i32, %1, %c0_i32_0 : i32, i32, i32, i32
  }
  func.func @transform_1(%arg0: i32, %arg1: i32, %arg2: i32) -> (i32, i32, i32, i32) {
    %c1_i32 = arith.constant 1 : i32
    %0 = arith.muli %arg0, %c1_i32 : i32
    %1 = arith.addi %0, %arg2 : i32
    %c0_i32 = arith.constant 0 : i32
    %c0_i32_0 = arith.constant 0 : i32
    %c0_i32_1 = arith.constant 0 : i32
    return %arg1, %c0_i32, %1, %c0_i32_0 : i32, i32, i32, i32
  }
  func.func @transform_2(%arg0: i32, %arg1: i32, %arg2: i32) -> (i32, i32, i32, i32) {
    %c0_i32 = arith.constant 0 : i32
    %c0_i32_0 = arith.constant 0 : i32
    %c0_i32_1 = arith.constant 0 : i32
    return %arg0, %arg1, %c0_i32, %c0_i32_0 : i32, i32, i32, i32
  }
  func.func @transform_3(%arg0: i32, %arg1: i32, %arg2: i32) -> (i32, i32, i32, i32) {
    %c0_i32 = arith.constant 0 : i32
    %c0_i32_0 = arith.constant 0 : i32
    %c0_i32_1 = arith.constant 0 : i32
    return %arg0, %arg1, %c0_i32, %c0_i32_0 : i32, i32, i32, i32
  }
  func.func @transform_4(%arg0: i32, %arg1: i32, %arg2: i32) -> (i32, i32, i32, i32) {
    %c0_i32 = arith.constant 0 : i32
    %c0_i32_0 = arith.constant 0 : i32
    %c0_i32_1 = arith.constant 0 : i32
    return %arg0, %arg1, %c0_i32, %c0_i32_0 : i32, i32, i32, i32
  }
}

</mosaic_0001>

<bundles_post_ra>
// kernel: tpu_custom_call.1
= control target key start
LH: loop header
LB: loop body
LE: loop exit
PB: predicated region body
PF: predicated region fallthrough
CT: control target
= control target key end

     0   :  { %s1326_s0 = inlined_call_operand.hbm [shape: f32[2,4,8,128], index: 0, kind: input, shape index: {}]   ;;  %s1327_s1 = inlined_call_operand.hbm [shape: f32[2,4,8,128], index: 1, kind: input, shape index: {}]   ;;  %s1328_s2 = inlined_call_operand.hbm [shape: f32[1,2,4,128], index: 2, kind: output, shape index: {0}]   ;;  %s1329_s3 = inlined_call_operand.hbm [shape: f32[1,2,4,128], index: 3, kind: output, shape index: {1}]   ;;  %s1330_s4 = inlined_call_operand.hbm [shape: f32[1,2,4,128], index: 4, kind: output, shape index: {2}]  }
   0x1   :  { %1333 = sst [smem:[#allocation17_spill]] %s1326_s0 }
   0x2   :  { %10 = vsyncpa [#allocation3], 0 }
   0x3   :  { %12 = vsyncpa [#allocation3 + $0x1], 0 }
   0x4   :  { %13 = vsyncpa [#allocation6], 0 }
   0x5   :  { %15 = vsyncpa [#allocation6 + $0x1], 0 }
   0x6   :  { %16 = vsyncpa [#allocation4], 0 }
   0x7   :  { %18 = vsyncpa [#allocation4 + $0x1], 0 }
   0x8   :  { %19 = vsyncpa [#allocation9], 0 }
   0x9   :  { %21 = vsyncpa [#allocation9 + $0x1], 0  ;;  %s1031_s15 = smov 0   ;;  %s1033_s16 = smov 0  }
   0xa   :  { %s1035_s17 = smov 0   ;;  %s1037_s18 = smov 0  }
   0xb   :  { %s1039_s19 = smov 0   ;;  %s1041_s20 = smov 0  }
   0xc LB: > { %s1062_s21 = sadd.s32 4294967295, %s996_s20   ;;  %s1331_s22 = sadd.s32 4294967294, %s996_s20   ;;  %s996_s20 = sphi %s1041_s20, %s27_s20   ;;  %s992_s19 = sphi %s1039_s19, %s1351_s19   ;;  %s988_s18 = sphi %s1037_s18, %s1350_s18   ;;  %s984_s17 = sphi %s1035_s17, %s1349_s17   ;;  %s980_s16 = sphi %s1033_s16, %s1348_s16   ;;  %s976_s15 = sphi %s1031_s15, %s1347_s15  }
   0xd   : > { %s42_s23 = sadd.s32 1, %s992_s19  ;;  %s57_s24 = sadd.s32 1, %s984_s17 }
   0xe   : > { %p44_p0 = scmp.ge.s32.totalorder %s42_s23, 2  ;;  %p64_p1 = scmp.ne.s32.totalorder %s984_s17, %s980_s16 }
   0xf   : > { %p65_p2 = scmp.eq.s32.totalorder %s996_s20, 0  ;;  %p70_p3 = scmp.ne.s32.totalorder %s980_s16, %s976_s15 }
  0x10   : > { %s1353_s23 = smov (%p44_p0, %s42_s23), 0  ;;  %p71_p5 = scmp.eq.s32.totalorder %s1062_s21, 0 }
  0x11   : > { %1334 = sst [smem:[#allocation15_spill]] %s1353_s23  ;;  %p1074_p4 = por %p65_p2, %p64_p1 }
  0x12   : > { %s52_s26 = ssub.s32 %s992_s19, %s1353_s23  ;;  %p126_p6 = scmp.eq.s32.totalorder %s1062_s21, 1 }
  0x13   : > { %p55_p7 = scmp.eq.s32.totalorder %s52_s26, 0  ;;  %p1082_p8 = por %p71_p5, %p70_p3 }
  0x14   : > { %p1086_p9 = por %p126_p6, %p64_p1  ;;  %p132_p10 = scmp.eq.s32.totalorder %s1331_s22, 1 }
  0x15   : > { %s1093_s29 = scalar_select %p55_p7, %s984_s17, %s57_s24  }
  0x16   : > { %p1095_p11 = por %p132_p10, %p70_p3  ;;  %p747_p13 = scmp.lt.s32.totalorder %s996_s20, 2 }
  0x17   : > { %1338 = sst [smem:[#allocation16_spill]] %s1093_s29  ;;  %s1102_s5 = sand.u32 1, %s984_s17  }
  0x18   : > { %s698_s6 = sshll.u32 %s1102_s5, 5  ;;  %s718_s7 = sshll.u32 %s992_s19, 9 }
  0x19   : > { %s1340_s0 = sld [smem:[#allocation17_spill]]  ;;  %s212_s11 = scalar_lea.vmem [#allocation2], %s698_s6 }
  0x1a   : > { %s221_s12 = sshll.u32 %s212_s11, 4  ;;  %p1115_p0 = pnand %p747_p13, %p1074_p4  ;;  %s222_s12 = int_to_ptr.vmem [resolvable:$true] %s221_s12 }
  0x1b   : > { %p704_p1 = scmp.ge.s32.totalorder %s996_s20, 1  ;;  %s209_s14 = scalar_lea.sflag [#allocation3], %s1102_s5 }
  0x1c   : > { %p802_p2 = pneg %p1115_p0  ;;  %s813_s24 = scalar_lea.vmem %s222_s12, 512 }
  0x1d   : > { %p814_p3 = scmp.ne.s32.totalorder %s222_s12, %s813_s24  ;;  %s998_s26 = smov [#allocation2]  }
  0x1e   : > { %s818_s8 = sshll.u32 %s998_s26, 4  ;;  %s819_s8 = int_to_ptr.vmem [resolvable:$false] %s818_s8 }
  0x1f   : > { %s220_s10 = scalar_lea.hbm %s1340_s0, %s718_s7  ;;  %p816_p5 = pnand %p814_p3, %p802_p2 }
  0x20   : > { %s820_s25 = scalar_lea.vmem %s819_s8, 1024  ;;  %p821_p4 = scmp.lt.s32.totalorder %s222_s12, %s819_s8 }
  0x21   : > { %p817_p6 = pneg %p816_p5  ;;  %p822_p7 = scmp.lt.s32.totalorder %s820_s25, %s813_s24 }
  0x23   : > { %p823_p10 = por %p822_p7, %p821_p4 }
  0x25   : > { %p824_p13 = pnand %p823_p10, %p817_p6 }
  0x27   : > { %827 = shalt.err (!%p824_p13)
}
  0x28   : > { %s999_s9 = smov 128   ;;  %s1000_s11 = smov 8  }
  0x29   : > { %733 = dma.hbm_to_vmem [thread:$0]  (!%p1115_p0), %s220_s10, 512, %s222_s12, %s209_s14, %s999_s9, %s999_s9, %s1000_s11  }
  0x2a   : > { %p252_p3 = scmp.lt.s32.totalorder %s996_s20, 3  ;;  %s243_s24 = scalar_lea.hbm %s1327_s1, %s718_s7 }
  0x2b   : > { %s235_s25 = scalar_lea.vmem [#allocation5], %s698_s6  ;;  %s232_s23 = scalar_lea.sflag [#allocation6], %s1102_s5 }
  0x2c   : > { %p1136_p5 = pnand %p704_p1, %p252_p3  ;;  %s244_s0 = sshll.u32 %s235_s25, 4  ;;  %s245_s0 = int_to_ptr.vmem [resolvable:$true] %s244_s0 }
  0x2d   : > { %s841_s29 = scalar_lea.vmem %s245_s0, 512  ;;  %s1001_s10 = smov [#allocation5]  }
  0x2e   : > { %p842_p6 = scmp.ne.s32.totalorder %s245_s0, %s841_s29  ;;  %s846_s12 = sshll.u32 %s1001_s10, 4  ;;  %s847_s12 = int_to_ptr.vmem [resolvable:$false] %s846_s12 }
  0x2f   : > { %s848_s22 = scalar_lea.vmem %s847_s12, 1024  ;;  %p849_p10 = scmp.lt.s32.totalorder %s245_s0, %s847_s12 }
  0x30   : > { %p844_p4 = pnand %p842_p6, %p802_p2  ;;  %p850_p1 = scmp.lt.s32.totalorder %s848_s22, %s841_s29 }
  0x32   : > { %p845_p7 = pneg %p844_p4  ;;  %p851_p13 = por %p850_p1, %p849_p10 }
  0x34   : > { %p852_p3 = pnand %p851_p13, %p845_p7 }
  0x36   : > { %855 = shalt.err (!%p852_p3)
}
  0x37   : > { %736 = dma.hbm_to_vmem [thread:$0]  (!%p1115_p0), %s243_s24, 512, %s245_s0, %s232_s23, %s999_s9, %s999_s9, %s1000_s11  }
  0x38   : > { %256 = sbr.rel (%p1136_p5) target bundleno = 149 (0x95), region = 28  ;;  %s1151_s5 = sand.u32 (!%p1136_p5), 1, %s980_s16  }
  0x39   : > { %s705_s6 = sshll.u32 (!%p1136_p5), %s1151_s5, 5  ;;  %s259_s7 = scalar_lea.sflag (!%p1136_p5), [#allocation3], %s1151_s5 }
  0x3a   : > { %s262_s14 = scalar_lea.vmem (!%p1136_p5), [#allocation2], %s705_s6 }
  0x3d   : > { %959 = dma.done.wait (%p1082_p8), %s259_s7, 512  }
  0x3e   : > { %961 = vsyncadd (%p1082_p8), %s259_s7, 4294966784  ;;  %s268_s0 = scalar_lea.sflag [#allocation6], %s1151_s5  ;;  %s1160_s23 = scalar_lea.vmem [#allocation5], %s705_s6 }
  0x3f   : > { %963 = dma.done.wait (%p1082_p8), %s268_s0, 512  }
  0x40   : > { %965 = vsyncadd (%p1082_p8), %s268_s0, 4294966784  ;;  %s707_s29 = sshll.u32 %s1151_s5, 2  ;;  %v329_v0 = vlaneseq  ;;  %v1002_v1 = vmov 0.0   ;;  %v320_v6 = vld [vmem:[%s262_s14] sm:$0xff]  ;;  %v321_v7 = vld [vmem:[%s262_s14 + $0x8] sm:$0xff]  ;;  %vm382_vm1 = vcmask 1041409  }
  0x41   : > { %s1167_s13 = scalar_lea.vmem [#allocation8], %s707_s29  ;;  %s1170_s9 = scalar_lea.vmem [#allocation7], %s707_s29  ;;  %v322_v8 = vld [vmem:[%s262_s14 + $0x10] sm:$0xff]  ;;  %v323_v9 = vld [vmem:[%s262_s14 + $0x18] sm:$0xff]  ;;  %v324_v10 = vld [vmem:[%s1160_s23] sm:$0xff]  ;;  %vm384_vm2 = vcmask 1042434  }
  0x42   : > { %318 = vst [vmem:[%s1167_s13] sm:$0xf] %v1002_v1  ;;  %317 = vst [vmem:[%s1170_s9] sm:$0xf] %v1002_v1  ;;  %v330_v2 = vshrl.u32 %v329_v0, 7  ;;  %v332_v3 = vand.u32 127, %v329_v0  ;;  %s1173_s11 = scalar_lea.vmem [#allocation10], %s707_s29  ;;  %v325_v11 = vld [vmem:[%s1160_s23 + $0x8] sm:$0xff] }
  0x43   : > { %319 = vst [vmem:[%s1173_s11] sm:$0xf] %v1002_v1  ;;  %v326_v20 = vld [vmem:[%s1160_s23 + $0x10] sm:$0xff]  ;;  %v327_v21 = vld [vmem:[%s1160_s23 + $0x18] sm:$0xff]  ;;  %vm386_vm3 = vcmask 1043459   ;;  %s466_s27 = sand.u32 1, %s1062_s21   ;;  %s1196_s26 = sshll.u32 %s988_s18, 6 }
  0x44   : > { %v336_v4 = vmul.u32 128, %v330_v2  ;;  %s502_s24 = sshll.u32 %s1167_s13, 4  ;;  %s1208_s25 = scalar_lea.hbm %s1329_s3, %s1196_s26  ;;  %s1210_s24 = int_to_ptr.vmem [resolvable:$true] %s502_s24 }
  0x45   : > { %s487_s10 = sshll.u32 %s1170_s9, 4  ;;  %s1221_s12 = scalar_lea.sflag [#allocation9], %s466_s27  ;;  %s1254_s10 = int_to_ptr.vmem [resolvable:$true] %s487_s10 }
  0x46   : > { %v337_v5 = vadd.s32 %v336_v4, %v332_v3  ;;  %s856_s22 = scalar_lea.vmem %s1210_s24, 64  ;;  %s1003_s6 = smov [#allocation8]  }
  0x47   : > { %p857_p8 = scmp.ne.s32.totalorder %s1210_s24, %s856_s22  ;;  %s860_s7 = sshll.u32 %s1003_s6, 4  ;;  %s861_s7 = int_to_ptr.vmem [resolvable:$false] %s860_s7 }
  0x48   : > { %vm338_vm0 = vcmp.lt.s32.totalorder %v337_v5, 256  ;;  %s862_s14 = scalar_lea.vmem %s861_s7, 128  ;;  %p863_p5 = scmp.lt.s32.totalorder %s1210_s24, %s861_s7 }
  0x49   : > { %v341_v12 = vsel %vm338_vm0, %v320_v6, 0.0  ;;  %v342_v13 = vsel %vm338_vm0, %v321_v7, 0.0  ;;  %v343_v14 = vsel %vm338_vm0, %v322_v8, 0.0  ;;  %v344_v15 = vsel %vm338_vm0, %v323_v9, 0.0  ;;  %v391_v2 = vld [vmem:[%s1167_s13] sm:$0xf]  ;;  %p858_p0 = pnand %p857_p8, %p1086_p9  ;;  %p864_p6 = scmp.lt.s32.totalorder %s862_s14, %s856_s22 }
  0x4a   : > { %v392_v16 = vrot.slane %v341_v12, 4  ;;  %v398_v17 = vrot.slane %v342_v13, 4  ;;  %v404_v18 = vrot.slane %v343_v14, 4  ;;  %v410_v19 = vrot.slane %v344_v15, 4 }
  0x4b   : > { %v345_v22 = vsel %vm338_vm0, %v324_v10, 0.0  ;;  %v346_v23 = vsel %vm338_vm0, %v325_v11, 0.0  ;;  %v1187_v24 = vsel %vm338_vm0, %v326_v20, 0.0  ;;  %v1190_v25 = vsel %vm338_vm0, %v327_v21, 0.0  ;;  %p859_p2 = pneg %p858_p0  ;;  %p865_p4 = por %p864_p6, %p863_p5 }
  0x4c   : > { %v393_v26 = vadd.f32 %v392_v16, %v341_v12  ;;  %v399_v27 = vadd.f32 %v398_v17, %v342_v13  ;;  %v405_v28 = vadd.f32 %v404_v18, %v343_v14  ;;  %v411_v29 = vadd.f32 %v410_v19, %v344_v15 }
  0x4d   : > { %v350_v30 = vmul.f32 %v345_v22, %v341_v12  ;;  %v351_v31 = vmul.f32 %v346_v23, %v342_v13  ;;  %v352_v32 = vmul.f32 %v1187_v24, %v343_v14  ;;  %v353_v33 = vmul.f32 %v1190_v25, %v344_v15  ;;  %p866_p7 = pnand %p865_p4, %p859_p2 }
  0x4e   : > { %v394_v34 = vrot.slane %v393_v26, 2  ;;  %v400_v35 = vrot.slane %v399_v27, 2  ;;  %v406_v36 = vrot.slane %v405_v28, 2  ;;  %v412_v37 = vrot.slane %v411_v29, 2 }
  0x4f   : > { %v354_v38 = vrot.slane %v350_v30, 4  ;;  %v360_v39 = vrot.slane %v351_v31, 4  ;;  %v366_v40 = vrot.slane %v352_v32, 4  ;;  %v372_v41 = vrot.slane %v353_v33, 4 }
  0x50   : > { %v395_v42 = vadd.f32 %v394_v34, %v393_v26  ;;  %v401_v43 = vadd.f32 %v400_v35, %v399_v27  ;;  %v407_v44 = vadd.f32 %v406_v36, %v405_v28  ;;  %v413_v45 = vadd.f32 %v412_v37, %v411_v29 }
  0x51   : > { %v355_v46 = vadd.f32 %v354_v38, %v350_v30  ;;  %v361_v47 = vadd.f32 %v360_v39, %v351_v31  ;;  %v367_v48 = vadd.f32 %v366_v40, %v352_v32  ;;  %v373_v49 = vadd.f32 %v372_v41, %v353_v33 }
  0x52   : > { %v396_v50 = vrot.slane %v395_v42, 1  ;;  %v402_v51 = vrot.slane %v401_v43, 1  ;;  %v408_v52 = vrot.slane %v407_v44, 1  ;;  %v414_v53 = vrot.slane %v413_v45, 1 }
  0x53   : > { %v356_v54 = vrot.slane %v355_v46, 2  ;;  %v362_v55 = vrot.slane %v361_v47, 2  ;;  %v368_v56 = vrot.slane %v367_v48, 2  ;;  %v374_v57 = vrot.slane %v373_v49, 2 }
  0x54   : > { %v397_v58 = vadd.f32 %v396_v50, %v395_v42  ;;  %v403_v59 = vadd.f32 %v402_v51, %v401_v43  ;;  %v409_v60 = vadd.f32 %v408_v52, %v407_v44  ;;  %v415_v61 = vadd.f32 %v414_v53, %v413_v45 }
  0x55   : > { %v357_v62 = vadd.f32 %v356_v54, %v355_v46  ;;  %v363_v63 = vadd.f32 %v362_v55, %v361_v47  ;;  %v369_v0 = vadd.f32 %v368_v56, %v367_v48  ;;  %v375_v1 = vadd.f32 %v374_v57, %v373_v49 }
  0x56   : > { %v420_v3 = vsel %vm382_vm1, %v403_v59, %v397_v58  ;;  %v427_v4 = vrot.slane %v345_v22, 4  ;;  %v433_v5 = vrot.slane %v346_v23, 4  ;;  %v439_v6 = vrot.slane %v1187_v24, 4 }
  0x57   : > { %v421_v7 = vsel %vm384_vm2, %v409_v60, %v420_v3  ;;  %v358_v8 = vrot.slane %v357_v62, 1  ;;  %v364_v9 = vrot.slane %v363_v63, 1  ;;  %v370_v10 = vrot.slane %v369_v0, 1 }
  0x58   : > { %v422_v11 = vsel %vm386_vm3, %v415_v61, %v421_v7  ;;  %v376_v12 = vrot.slane %v375_v1, 1  ;;  %v428_v13 = vadd.f32 %v427_v4, %v345_v22  ;;  %v434_v14 = vadd.f32 %v433_v5, %v346_v23  ;;  %v349_v23 = vld [vmem:[%s1170_s9] sm:$0xf] }
  0x59   : > { %v424_v15 = vadd.f32 %v422_v11, %v391_v2  ;;  %v359_v16 = vadd.f32 %v358_v8, %v357_v62  ;;  %v365_v17 = vadd.f32 %v364_v9, %v363_v63  ;;  %v371_v18 = vadd.f32 %v370_v10, %v369_v0 }
  0x5a   : > { %v377_v19 = vadd.f32 %v376_v12, %v375_v1  ;;  %v429_v20 = vrot.slane %v428_v13, 2  ;;  %v435_v21 = vrot.slane %v434_v14, 2  ;;  %v440_v22 = vadd.f32 %v439_v6, %v1187_v24 }
  0x5b   : > { %425 = vst [vmem:[%s1167_s13] sm:$0xf] %v424_v15  ;;  %v383_v26 = vsel %vm382_vm1, %v365_v17, %v359_v16  ;;  %v445_v27 = vrot.slane %v1190_v25, 4 }
  0x5c   : > { %v385_v28 = vsel %vm384_vm2, %v371_v18, %v383_v26  ;;  %v430_v29 = vadd.f32 %v429_v20, %v428_v13  ;;  %v436_v30 = vadd.f32 %v435_v21, %v434_v14  ;;  %v441_v31 = vrot.slane %v440_v22, 2 }
  0x5d   : > { %869 = shalt.err (!%p866_p7)
}
  0x5e   : > { %s870_s21 = scalar_lea.hbm %s1208_s25, 64  ;;  %s874_s29 = scalar_lea.hbm %s1329_s3, 128 }
  0x5f   : > { %p871_p10 = scmp.ne.s32.totalorder %s1208_s25, %s870_s21  ;;  %p875_p3 = scmp.lt.s32.totalorder %s1208_s25, %s1329_s3 }
  0x60   : > { %p876_p8 = scmp.lt.s32.totalorder %s874_s29, %s870_s21 }
  0x61   : > { %p872_p1 = pnand %p871_p10, %p1086_p9 }
  0x62   : > { %p877_p0 = por %p876_p8, %p875_p3 }
  0x63   : > { %p873_p13 = pneg %p872_p1 }
  0x65   : > { %p878_p2 = pnand %p877_p0, %p873_p13 }
  0x67   : > { %881 = shalt.err (!%p878_p2)
}
  0x68   : > { %725 = dma.vmem_to_hbm [thread:$0]  (%p1086_p9), %s1210_s24, 64, %s1208_s25, %s1221_s12   ;;  %v387_v24 = vsel %vm386_vm3, %v377_v19, %v385_v28  ;;  %v446_v32 = vadd.f32 %v445_v27, %v1190_v25  ;;  %v431_v34 = vrot.slane %v430_v29, 1  ;;  %v437_v35 = vrot.slane %v436_v30, 1 }
  0x69   : > { %v389_v33 = vadd.f32 %v387_v24, %v349_v23  ;;  %v442_v36 = vadd.f32 %v441_v31, %v440_v22  ;;  %s1250_s22 = scalar_lea.hbm %s1328_s2, %s1196_s26  ;;  %s462_s24 = scalar_lea.sflag [#allocation4], %s1151_s5 }
  0x6a   : > { %v447_v37 = vrot.slane %v446_v32, 2  ;;  %v432_v38 = vadd.f32 %v431_v34, %v430_v29  ;;  %v438_v25 = vadd.f32 %v437_v35, %v436_v30  ;;  %s882_s25 = scalar_lea.vmem %s1254_s10, 64  ;;  %s1004_s6 = smov [#allocation7]  }
  0x6b   : > { %390 = vst [vmem:[%s1170_s9] sm:$0xf] %v389_v33  ;;  %v443_v39 = vrot.slane %v442_v36, 1  ;;  %p883_p5 = scmp.ne.s32.totalorder %s1254_s10, %s882_s25  ;;  %s886_s7 = sshll.u32 %s1004_s6, 4  ;;  %s887_s7 = int_to_ptr.vmem [resolvable:$false] %s886_s7 }
  0x6c   : > { %v448_v40 = vadd.f32 %v447_v37, %v446_v32  ;;  %s888_s14 = scalar_lea.vmem %s887_s7, 128  ;;  %p889_p7 = scmp.lt.s32.totalorder %s1254_s10, %s887_s7 }
  0x6d   : > { %p884_p6 = pnand %p883_p5, %p1086_p9  ;;  %p890_p10 = scmp.lt.s32.totalorder %s888_s14, %s882_s25 }
  0x6f   : > { %p885_p4 = pneg %p884_p6  ;;  %p891_p1 = por %p890_p10, %p889_p7 }
  0x71   : > { %p892_p13 = pnand %p891_p1, %p885_p4 }
  0x73   : > { %895 = shalt.err (!%p892_p13)
}
  0x74   : > { %s896_s9 = scalar_lea.hbm %s1250_s22, 64  ;;  %s900_s0 = scalar_lea.hbm %s1328_s2, 128 }
  0x75   : > { %p897_p3 = scmp.ne.s32.totalorder %s1250_s22, %s896_s9  ;;  %p901_p2 = scmp.lt.s32.totalorder %s1250_s22, %s1328_s2 }
  0x76   : > { %p902_p5 = scmp.lt.s32.totalorder %s900_s0, %s896_s9 }
  0x77   : > { %p898_p8 = pnand %p897_p3, %p1086_p9 }
  0x78   : > { %p903_p6 = por %p902_p5, %p901_p2 }
  0x79   : > { %p899_p0 = pneg %p898_p8 }
  0x7b   : > { %p904_p4 = pnand %p903_p6, %p899_p0 }
  0x7d   : > { %907 = shalt.err (!%p904_p4)
}
  0x7e   : > { %724 = dma.vmem_to_hbm [thread:$0]  (%p1086_p9), %s1254_s10, 64, %s1250_s22, %s462_s24   ;;  %v444_v41 = vadd.f32 %v443_v39, %v442_v36  ;;  %v455_v42 = vsel %vm382_vm1, %v438_v25, %v432_v38  ;;  %v449_v43 = vrot.slane %v448_v40, 1  ;;  %v426_v45 = vld [vmem:[%s1173_s11] sm:$0xf] }
  0x7f   : > { %s517_s13 = sshll.u32 %s1173_s11, 4  ;;  %s515_s8 = scalar_lea.hbm %s1330_s4, %s1196_s26  ;;  %s518_s13 = int_to_ptr.vmem [resolvable:$true] %s517_s13 }
  0x80   : > { %v456_v44 = vsel %vm384_vm2, %v444_v41, %v455_v42  ;;  %v450_v46 = vadd.f32 %v449_v43, %v448_v40  ;;  %s908_s25 = scalar_lea.vmem %s518_s13, 64  ;;  %s1005_s10 = smov [#allocation10]  }
  0x81   : > { %p909_p7 = scmp.ne.s32.totalorder %s518_s13, %s908_s25  ;;  %s912_s22 = sshll.u32 %s1005_s10, 4  ;;  %s913_s22 = int_to_ptr.vmem [resolvable:$false] %s912_s22 }
  0x82   : > { %v457_v47 = vsel %vm386_vm3, %v450_v46, %v456_v44  ;;  %s914_s24 = scalar_lea.vmem %s913_s22, 128  ;;  %p915_p13 = scmp.lt.s32.totalorder %s518_s13, %s913_s22 }
  0x83   : > { %v459_v48 = vadd.f32 %v457_v47, %v426_v45  ;;  %p910_p10 = pnand %p909_p7, %p1086_p9  ;;  %p916_p3 = scmp.lt.s32.totalorder %s914_s24, %s908_s25 }
  0x85   : > { %460 = vst [vmem:[%s1173_s11] sm:$0xf] %v459_v48  ;;  %p911_p1 = pneg %p910_p10  ;;  %p917_p8 = por %p916_p3, %p915_p13 }
  0x87   : > { %p918_p0 = pnand %p917_p8, %p911_p1 }
  0x89   : > { %921 = shalt.err (!%p918_p0)
}
  0x8a   : > { %s922_s6 = scalar_lea.hbm %s515_s8, 64  ;;  %s926_s7 = scalar_lea.hbm %s1330_s4, 128 }
  0x8b   : > { %p923_p2 = scmp.ne.s32.totalorder %s515_s8, %s922_s6  ;;  %p927_p4 = scmp.lt.s32.totalorder %s515_s8, %s1330_s4 }
  0x8c   : > { %p928_p7 = scmp.lt.s32.totalorder %s926_s7, %s922_s6 }
  0x8d   : > { %p924_p5 = pnand %p923_p2, %p1086_p9 }
  0x8e   : > { %p929_p10 = por %p928_p7, %p927_p4 }
  0x8f   : > { %p925_p6 = pneg %p924_p5 }
  0x91   : > { %p930_p12 = pnand %p929_p10, %p925_p6 }
  0x93   : > { %933 = shalt.err (!%p930_p12)
}
  0x94   : > { %726 = dma.vmem_to_hbm [thread:$0]  (%p1086_p9), %s518_s13, 64, %s515_s8, %s1221_s12  }
  0x95 PF: > { %s529_s5 = sand.u32 1, %s976_s15   ;;  %p1343_p1 = scmp.ge.s32.totalorder %s996_s20, 2 }
  0x96   : > { %s530_s21 = scalar_lea.sflag [#allocation4], %s529_s5 }
  0x97   : > { %p738_p13 = pnand %p1343_p1, %p1095_p11 }
  0x99   : > { %p739_p3 = pneg %p738_p13 }
  0x9b   : > { %967 = dma.done.wait (%p739_p3), %s530_s21, 64  }
  0x9c   : > { %969 = vsyncadd (%p739_p3), %s530_s21, 4294967232  ;;  %s1344_s0 = sadd.s32 4294967294, %s996_s20  }
  0x9d   : > { %s538_s23 = sand.u32 1, %s1344_s0  }
  0x9e   : > { %s539_s29 = scalar_lea.sflag [#allocation9], %s538_s23 }
  0x9f   : > { %971 = dma.done.wait (%p739_p3), %s539_s29, 128  }
  0xa0   : > { %973 = vsyncadd (%p739_p3), %s539_s29, 4294967168  ;;  %s27_s20 = sadd.s32 1, %s996_s20   ;;  %s1345_s28 = sld [smem:[#allocation16_spill]] }
  0xa1   : > { %p24_p9 = scmp.ge.s32.totalorder %s27_s20, 4   ;;  %s1346_s30 = sld [smem:[#allocation15_spill]] }
  0xa2   : > { %s1347_s15 = smov %s980_s16  ;;  %s1348_s16 = smov %s984_s17 }
  0xa3   : > { %s1350_s18 = smov %s992_s19  ;;  %26 = sbr.rel (!%p24_p9) target bundleno = 12 (0xc), region = 122 }
  0xa6   : > { %s1349_s17 = smov %s1345_s28 }
  0xa7   : > { %s1351_s19 = smov %s1346_s30 }
  0xa8   :  { %553 = vsyncpa [#allocation3], 1 }
  0xa9   :  { %555 = vsyncpa [#allocation3 + $0x1], 1 }
  0xaa   :  { %556 = vsyncpa [#allocation6], 1 }
  0xab   :  { %558 = vsyncpa [#allocation6 + $0x1], 1 }
  0xac   :  { %559 = vsyncpa [#allocation4], 1 }
  0xad   :  { %561 = vsyncpa [#allocation4 + $0x1], 1 }
  0xae   :  { %562 = vsyncpa [#allocation9], 1 }
  0xaf   :  { %564 = vsyncpa [#allocation9 + $0x1], 1 }

</bundles_post_ra>
